<compile_context>
chip_gen: v7x
topology: tpu7x:2x2x1
jax: 0.10.0
libtpu: 0.0.40
codegen_flags: <defaults>
</compile_context>

<pallas_src>
import numpy as np
import jax
import jax.numpy as jnp
from jax.experimental import pallas as pl
from jax.experimental.pallas import tpu as pltpu

embed_size = 10

prompts_and_movements = [
    ('circle moving down', 'circle', 'down'),
    ('circle moving left', 'circle', 'left'),
    ('circle moving right', 'circle', 'right'),
    ('circle moving diagonally up-right', 'circle', 'diagonal_up_right'),
    ('circle moving diagonally down-left', 'circle', 'diagonal_down_left'),
    ('circle moving diagonally up-left', 'circle', 'diagonal_up_left'),
    ('circle moving diagonally down-right', 'circle', 'diagonal_down_right'),
    ('circle rotating clockwise', 'circle', 'rotate_clockwise'),
    ('circle rotating counter-clockwise', 'circle', 'rotate_counter_clockwise'),
    ('circle shrinking', 'circle', 'shrink'),
    ('circle expanding', 'circle', 'expand'),
    ('circle bouncing vertically', 'circle', 'bounce_vertical'),
    ('circle bouncing horizontally', 'circle', 'bounce_horizontal'),
    ('circle zigzagging vertically', 'circle', 'zigzag_vertical'),
    ('circle zigzagging horizontally', 'circle', 'zigzag_horizontal'),
    ('circle moving up-left', 'circle', 'up_left'),
    ('circle moving down-right', 'circle', 'down_right'),
    ('circle moving down-left', 'circle', 'down_left'),
]

all_prompts = [prompt for prompt, _, _ in prompts_and_movements]
vocab = {word: idx for idx, word in enumerate(set(' '.join(all_prompts).split()))}
vocab_size = len(vocab)

_LANE = 128     # lane width  -> last-dim padding target
_SUBLANE = 8    # f32 sublanes -> second-to-last padding target


def _round_up(x, m):
    return ((x + m - 1) // m) * m


def pad_embedding_table(table):
    """One-time (init-time) padding of the (V, E) table to (V_pad, E_pad).

    Hoisted out of the forward path so real-size tables are not re-copied in
    HBM on every call."""
    v, e = table.shape
    v_pad = _round_up(v, _SUBLANE)
    e_pad = _round_up(e, _LANE)
    return jnp.pad(table, ((0, v_pad - v), (0, e_pad - e)))


def _embed_kernel(ids_ref, table_ref, out_ref):
    # ids_ref:   (row_block, 1)       int32   (VMEM)
    # table_ref: (V_pad, E_pad)       f32     (VMEM-resident, fetched once)
    # out_ref:   (row_block, E_pad)   f32     (lane/sublane dense store)
    ids = ids_ref[...]
    r = ids.shape[0]
    v_pad = table_ref.shape[0]
    # One-hot gather on the MXU: (r, V_pad) @ (V_pad, E_pad).
    onehot = (ids == jax.lax.broadcasted_iota(jnp.int32, (r, v_pad), 1)
              ).astype(table_ref.dtype)
    out_ref[...] = jnp.dot(
        onehot, table_ref[...], preferred_element_type=jnp.float32
    ).astype(out_ref.dtype)


def text_embedding(x_ids, table_padded, embed_dim):
    """Pallas equivalent of TextEmbedding.forward: table[x_ids].

    `table_padded` must be the output of `pad_embedding_table` (padding is a
    parameter-init concern, not a per-forward one)."""
    orig_shape = x_ids.shape
    flat_ids = x_ids.reshape(-1).astype(jnp.int32)
    n = int(flat_ids.shape[0])
    v_pad, e_pad = table_padded.shape
    dtype = table_padded.dtype

    # Tokens per grid step: multiple of 8 (full-vreg f32 stores); one step for
    # small inputs, 256-token chunks for large ones.
    row_block = min(256, _round_up(n, _SUBLANE))
    n_pad = _round_up(n, row_block)
    if n_pad != n:
        flat_ids = jnp.pad(flat_ids, (0, n_pad - n))   # pad tokens -> row 0, sliced off
    ids_2d = flat_ids.reshape(n_pad, 1)

    n_steps = n_pad // row_block
    itemsize = jnp.dtype(dtype).itemsize

    out = pl.pallas_call(
        _embed_kernel,
        out_shape=jax.ShapeDtypeStruct((n_pad, e_pad), dtype),
        grid=(n_steps,),
        in_specs=[
            # Token ids for this chunk.
            pl.BlockSpec((row_block, 1), lambda i: (i, 0)),
            # Whole table; constant block index -> DMA'd once, stays in VMEM.
            pl.BlockSpec((v_pad, e_pad), lambda i: (0, 0)),
        ],
        out_specs=pl.BlockSpec((row_block, e_pad), lambda i: (i, 0)),
        compiler_params=pltpu.CompilerParams(
            dimension_semantics=("parallel",),
        ),
        cost_estimate=pl.CostEstimate(
            flops=2 * n_pad * v_pad * e_pad,
            transcendentals=0,
            bytes_accessed=(v_pad * e_pad * itemsize
                            + n_pad * 4
                            + n_pad * e_pad * itemsize),
        ),
    )(ids_2d, table_padded)

    out = out[:n, :embed_dim]
    return out.reshape(*orig_shape, embed_dim)


if __name__ == "__main__":
    key = jax.random.PRNGKey(0)
    k_table, k_ids = jax.random.split(key)

    # nn.Embedding default init: N(0, 1).
    table = jax.random.normal(k_table, (vocab_size, embed_size), dtype=jnp.float32)
    table_padded = pad_embedding_table(table)   # done once, at "init"

    # Example token-id input: (batch=2, seq=8) int32, analogous to a padded
    # batch of tokenized prompts fed to the PyTorch module.
    x_ids = jax.random.randint(k_ids, (2, 8), 0, vocab_size, dtype=jnp.int32)

    out = text_embedding(x_ids, table_padded, embed_size)
    out = jax.block_until_ready(out)

    # Reference: plain gather, matches nn.Embedding forward semantics.
    ref = table[x_ids]
    assert out.shape == (2, 8, embed_size)
    assert out.dtype == jnp.float32
    np.testing.assert_allclose(np.asarray(out), np.asarray(ref), rtol=1e-6, atol=1e-6)

    print("KERNEL_OK")
</pallas_src>

<mosaic_0001>
module attributes {stable_mosaic.version = 11 : i64} {
  func.func @_embed_kernel(%arg0: i32, %arg1: memref<16x1xi32, #tpu.memory_space<vmem>>, %arg2: memref<24x128xf32, #tpu.memory_space<vmem>>, %arg3: memref<16x128xf32, #tpu.memory_space<vmem>>) attributes {dimension_semantics = [#tpu.dimension_semantics<parallel>], iteration_bounds = array<i64: 1>, scalar_prefetch = 0 : i64, scratch_operands = 0 : i64, tpu.core_type = #tpu.core_type<tc>, window_params = [{transform_indices = @transform_0, window_bounds = array<i64: 16, 1>}, {pipeline_mode = #tpu.pipeline_mode<synchronous>, transform_indices = @transform_1, window_bounds = array<i64: 24, 128>}, {transform_indices = @transform_2, window_bounds = array<i64: 16, 128>}]} {
    %c0 = arith.constant 0 : index
    %c0_0 = arith.constant 0 : index
    %0 = vector.load %arg1[%c0, %c0_0] : memref<16x1xi32, #tpu.memory_space<vmem>>, vector<16x1xi32>
    %1 = tpu.iota {dimensions = array<i32: 1>} : vector<16x24xi32>
    %2 = vector.broadcast %0 : vector<16x1xi32> to vector<16x24xi32>
    %3 = arith.cmpi eq, %2, %1 : vector<16x24xi32>
    %4 = arith.extui %3 : vector<16x24xi1> to vector<16x24xi32>
    %5 = arith.sitofp %4 : vector<16x24xi32> to vector<16x24xf32>
    %c0_1 = arith.constant 0 : index
    %c0_2 = arith.constant 0 : index
    %6 = vector.load %arg2[%c0_1, %c0_2] : memref<24x128xf32, #tpu.memory_space<vmem>>, vector<24x128xf32>
    %cst = arith.constant dense<0.000000e+00> : vector<16x128xf32>
    %7 = tpu.matmul %5, %6, %cst {dimension_numbers = #tpu.dot_dimension_numbers<[1], [0], [0], [1], [0, 0, 1, 1], [], []>} : vector<16x24xf32>, vector<24x128xf32>, vector<16x128xf32> -> vector<16x128xf32>
    %c0_3 = arith.constant 0 : index
    %c0_4 = arith.constant 0 : index
    %8 = vector.load %arg3[%c0_3, %c0_4] : memref<16x128xf32, #tpu.memory_space<vmem>>, vector<16x128xf32>
    tpu.vector_store %arg3[%c0_3, %c0_4], %7 {strides = array<i32>} : memref<16x128xf32, #tpu.memory_space<vmem>>, vector<16x128xf32>,
    return
  }
  func.func @transform_0(%arg0: i32) -> (i32, i32) {
    %c0_i32 = arith.constant 0 : i32
    %c0_i32_0 = arith.constant 0 : i32
    return %arg0, %c0_i32 : i32, i32
  }
  func.func @transform_1(%arg0: i32) -> (i32, i32) {
    %c0_i32 = arith.constant 0 : i32
    %c0_i32_0 = arith.constant 0 : i32
    %c0_i32_1 = arith.constant 0 : i32
    return %c0_i32, %c0_i32_0 : i32, i32
  }
  func.func @transform_2(%arg0: i32) -> (i32, i32) {
    %c0_i32 = arith.constant 0 : i32
    %c0_i32_0 = arith.constant 0 : i32
    return %arg0, %c0_i32 : i32, i32
  }
}

</mosaic_0001>

<bundles_post_ra>
// kernel: tpu_custom_call.1
= control target key start
LH: loop header
LB: loop body
LE: loop exit
PB: predicated region body
PF: predicated region fallthrough
CT: control target
= control target key end

     0   :  { %7 = vsyncpa [#allocation3], 0  ;;  %s280_s0 = inlined_call_operand.vmem [shape: s32[16,1], index: 0, kind: input, shape index: {}]   ;;  %s281_s1 = inlined_call_operand.hbm [shape: f32[24,128], index: 1, kind: input, shape index: {}]   ;;  %s282_s2 = inlined_call_operand.hbm [shape: f32[16,128], index: 2, kind: output, shape index: {}]  }
   0x1   :  { %8 = vsyncpa [#allocation4], 0  ;;  %s223_s9 = smov [#allocation2]   ;;  %s175_s13 = scalar_lea.hbm %s281_s1, 384 }
   0x2   :  { %s16_s10 = sshll.u32 %s223_s9, 4  ;;  %p176_p0 = scmp.ne.s32.totalorder %s281_s1, %s175_s13  ;;  %s17_s10 = int_to_ptr.vmem [resolvable:$true] %s16_s10 }
   0x3   :  { %p179_p1 = scmp.lt.u32.totalorder %s175_s13, %s281_s1 }
   0x5   :  { %p181_p2 = pnand %p179_p1, %p176_p0 }
   0x7   :  { %184 = shalt.err (!%p181_p2)
}
   0x8   :  { %s185_s18 = scalar_lea.vmem %s17_s10, 384  ;;  %p190_p4 = scmp.lt.s32.totalorder %s17_s10, %s17_s10 }
   0x9   :  { %p186_p3 = scmp.ne.s32.totalorder %s17_s10, %s185_s18  ;;  %p191_p5 = scmp.lt.s32.totalorder %s185_s18, %s185_s18 }
   0xb   :  { %p192_p6 = por %p191_p5, %p190_p4 }
   0xd   :  { %p193_p7 = pnand %p192_p6, %p186_p3 }
   0xf   :  { %196 = shalt.err (!%p193_p7)
}
  0x10   :  { %s224_s19 = smov 128   ;;  %s225_s20 = smov 8  }
  0x11   :  { %22 = dma.hbm_to_vmem [thread:$0]  %s281_s1, 384, %s17_s10, [#allocation3], %s224_s19, %s224_s19, %s225_s20  }
  0x12   :  { %219 = dma.done.wait [#allocation3], 384  }
  0x13   :  { %220 = vsyncadd [#allocation3], 4294966912  ;;  %v226_v0 = vmov 0   ;;  %v26_v1 = vld [vmem:[%s280_s0] sm:$0xff]  ;;  %v43_v3 = vld [vmem:[#allocation2 + $0x8] sm:$0xff]  ;;  %v28_v7 = vlaneseq  ;;  %vm45_vm0 = vcmask 195584  }
  0x14   :  { %174 = vset.pattern.permute.xlu0 %v226_v0  ;;  %v42_v2 = vld [vmem:[#allocation2] sm:$0xff]  ;;  %v27_v4 = vld [vmem:[%s280_s0 + $0x8] sm:$0xff]  ;;  %v44_v6 = vld [vmem:[#allocation2 + $0x10] sm:$0xff]  ;;  %v227_v10 = vmov 0.0   ;;  %s228_s0 = smov [#allocation5]  }
  0x15   :  { %31 = vperm.xlu0 %174, %v26_v1   ;;  %v164_v5 = vpack.c.bf16 %v43_v3, %v42_v2  ;;  %v29_v8 = vand.u32 127, %v28_v7  ;;  %s134_s1 = sshll.u32 %s228_s0, 4  ;;  %s135_s1 = int_to_ptr.vmem [resolvable:$true] %s134_s1 }
  0x16   :  { %s197_s27 = scalar_lea.vmem %s135_s1, 256  ;;  %p202_p9 = scmp.lt.s32.totalorder %s135_s1, %s135_s1 }
  0x17   :  { %165 = vmatprep.subr.bf16.mxu0 %v164_v5  ;;  %p198_p8 = scmp.ne.s32.totalorder %s135_s1, %s197_s27  ;;  %p203_p10 = scmp.lt.s32.totalorder %s197_s27, %s197_s27 }
  0x18   :  { %167 = vmatpush3.bf16.msra.mxu0 %v164_v5 }
  0x19   :  { %34 = vperm.xlu0 %174, %v27_v4   ;;  %159 = vmatprep.subr.mxu0 %v44_v6  ;;  %p204_p11 = por %p203_p10, %p202_p9 }
  0x1b   :  { %p205_p12 = pnand %p204_p11, %p198_p8 }
  0x1c   :  { %160 = vmatpush3.msra.mxu0 %v44_v6 }
  0x94   :  { %v32_v9 = vpop.permute.xlu0 %31 }
  0x95   :  { %vm36_vm1 = vcmp.eq.s32.totalorder %v32_v9, %v29_v8 }
  0x96   :  { %v146_v11 = vsel %vm36_vm1, 1.0, %v227_v10 }
  0x97   :  { %161 = vmatprep.mubr.msk.f32.mxu0 %vm45_vm0, %v146_v11 }
  0x98   :  { %v35_v12 = vpop.permute.xlu0 %34 }
  0x99   :  { %vm37_vm2 = vcmp.eq.s32.totalorder %v35_v12, %v29_v8 }
  0x9a   :  { %v147_v13 = vsel %vm37_vm2, 1.0, %v227_v10 }
  0x9b   :  { %162 = vmatmul.mubr.msk.f32.vlgmr.msra.gmra.mrb[0].mxu0 %vm45_vm0, %v147_v13 }
 0x16e   :  { %v163_v14 = vpop.f32.mrb[0].mxu0 }
 0x16f   :  { %128 = vst [vmem:[#allocation5 + $0x8] sm:$0xff] %v163_v14  ;;  %v118_v15 = vpop.f32.mrb[1].mxu0 }
 0x170   :  { %127 = vst [vmem:[#allocation5] sm:$0xff] %v118_v15 }
 0x171   :  { %208 = shalt.err (!%p205_p12)
}
 0x172   :  { %s209_s30 = scalar_lea.hbm %s282_s2, 256 }
 0x173   :  { %p210_p13 = scmp.ne.s32.totalorder %s282_s2, %s209_s30  ;;  %p213_p0 = scmp.lt.u32.totalorder %s209_s30, %s282_s2 }
 0x175   :  { %p215_p1 = pnand %p213_p0, %p210_p13 }
 0x177   :  { %218 = shalt.err (!%p215_p1)
}
 0x178   :  { %140 = dma.vmem_to_hbm [thread:$0]  %s135_s1, 256, %s282_s2, [#allocation4], %s224_s19, %s224_s19, %s225_s20  }
 0x179   :  { %221 = dma.done.wait [#allocation4], 256  }
 0x17a   :  { %222 = vsyncadd [#allocation4], 4294967040 }
 0x17b   :  { %144 = vsyncpa [#allocation3], 1 }
 0x17c   :  { %145 = vsyncpa [#allocation4], 1 }

</bundles_post_ra>
